<compile_context>
chip_gen: v7x
topology: tpu7x:2x2x1
jax: 0.10.0
libtpu: 0.0.40
codegen_flags: <defaults>
</compile_context>

<pallas_src>
import functools

import jax
import jax.numpy as jnp
import numpy as np
from jax.experimental import pallas as pl
from jax.experimental.pallas import tpu as pltpu

HUBER_DELTA = 5.0
W_AGE, W_BMI, W_SEX = 68.13, 20.13, 0.62

# Per-input-buffer byte budget for one lane tile.  Double-buffered by the BlockSpec
# pipeline this stays far below the scoped-VMEM defaults of every TPU generation
# (v5e 16 MiB, v6e 32 MiB, v7x 32 MiB scoped / 64 MiB physical).
_TARGET_TILE_BYTES = 2 * 1024 * 1024


def _huber(dif, s):
    # Divides by constants are folded into multiplies at trace time.
    l2 = dif * dif * (0.5 / s)
    l1 = dif * (HUBER_DELTA / s) - (0.5 * HUBER_DELTA * HUBER_DELTA / s)
    return jnp.where(dif < HUBER_DELTA, l2, l1)


def _multi_label_loss_kernel(slab_ref, out_ref,
                             acc_hub_age, acc_hub_bmi, acc_ce,
                             acc_age_l1, acc_bmi_l1, acc_correct,
                             *, n_valid, n_classes, tile_n, masked):
    """slab_ref: (n_classes + 5, tile_n) f32 block.

    Row layout: [age_pred, bmi_pred, logit_0..logit_{K-1}, age_t, bmi_t, sex_t].
    out_ref: (1, 8) f32, lanes = [loss, age_l1, bmi_l1, sex_ce, sex_acc, 0, 0, 0].
    """
    i = pl.program_id(0)
    last = pl.num_programs(0) - 1
    k = n_classes

    @pl.when(i == 0)
    def _init():
        for acc in (acc_hub_age, acc_hub_bmi, acc_ce,
                    acc_age_l1, acc_bmi_l1, acc_correct):
            acc[...] = jnp.zeros_like(acc)

    # ---- per-sample (per-lane) values, all shaped (1, tile_n) ----
    age_p = slab_ref[0:1, :]
    bmi_p = slab_ref[1:2, :]
    age_t = slab_ref[k + 2:k + 3, :]
    bmi_t = slab_ref[k + 3:k + 4, :]
    sex_t = slab_ref[k + 4:k + 5, :]

    age_dif = jnp.abs(age_t - age_p)
    bmi_dif = jnp.abs(bmi_t - bmi_p)
    hub_age = _huber(age_dif, W_AGE)
    hub_bmi = _huber(bmi_dif, W_BMI)

    if k == 2:
        # Specialized 2-class head: CE = softplus(z) - y*z with z = logit1 - logit0.
        l0 = slab_ref[2:3, :]
        l1 = slab_ref[3:4, :]
        z = l1 - l0
        ce = jnp.maximum(z, 0.0) + jnp.log(1.0 + jnp.exp(-jnp.abs(z))) - sex_t * z
        pred = (l1 > l0).astype(jnp.float32)          # tie -> class 0 (first max)
        correct = (pred == sex_t).astype(jnp.float32)
    else:
        # General K: statically unrolled over the (small) class count; pure
        # elementwise (1, tile_n) ops, no cross-sublane reductions needed.
        rows = [slab_ref[2 + j:3 + j, :] for j in range(k)]
        m = rows[0]
        for rj in rows[1:]:
            m = jnp.maximum(m, rj)
        se = jnp.exp(rows[0] - m)
        for rj in rows[1:]:
            se = se + jnp.exp(rj - m)
        lse = jnp.log(se)
        label_logit = jnp.zeros_like(m)
        for j, rj in enumerate(rows):
            label_logit = label_logit + jnp.where(sex_t == float(j), rj - m, 0.0)
        ce = lse - label_logit
        # argmax with first-max tie-break
        pred = jnp.zeros_like(m)
        best = rows[0]
        for j, rj in enumerate(rows[1:], start=1):
            better = rj > best
            pred = jnp.where(better, float(j), pred)
            best = jnp.maximum(best, rj)
        correct = (pred == sex_t).astype(jnp.float32)

    if masked:  # zero out padded lanes of the last tile (trace-time guard)
        lane = jax.lax.broadcasted_iota(jnp.int32, (1, tile_n), 1) + i * tile_n
        valid = (lane < n_valid).astype(jnp.float32)
        age_dif = age_dif * valid
        bmi_dif = bmi_dif * valid
        hub_age = hub_age * valid
        hub_bmi = hub_bmi * valid
        ce = ce * valid
        correct = correct * valid

    # ---- accumulate per-tile partial sums (lane reductions, keepdims) ----
    acc_age_l1[...] += jnp.sum(age_dif, axis=1, keepdims=True)
    acc_bmi_l1[...] += jnp.sum(bmi_dif, axis=1, keepdims=True)
    acc_hub_age[...] += jnp.sum(hub_age, axis=1, keepdims=True)
    acc_hub_bmi[...] += jnp.sum(hub_bmi, axis=1, keepdims=True)
    acc_ce[...] += jnp.sum(ce, axis=1, keepdims=True)
    acc_correct[...] += jnp.sum(correct, axis=1, keepdims=True)

    # ---- finalize: means, combined loss, one packed lane-vector store ----
    @pl.when(i == last)
    def _finalize():
        inv_n = 1.0 / n_valid
        age_l1 = acc_age_l1[...] * inv_n
        bmi_l1 = acc_bmi_l1[...] * inv_n
        hub_age_m = acc_hub_age[...] * inv_n
        hub_bmi_m = acc_hub_bmi[...] * inv_n
        sex_ce = acc_ce[...] * inv_n
        sex_acc = acc_correct[...] * inv_n
        loss = (hub_age_m + hub_bmi_m + sex_ce * (1.0 / W_SEX)) * (1.0 / 3.0)
        lane = jax.lax.broadcasted_iota(jnp.int32, (1, 8), 1)
        packed = jnp.where(lane == 0, loss,
                 jnp.where(lane == 1, age_l1,
                 jnp.where(lane == 2, bmi_l1,
                 jnp.where(lane == 3, sex_ce,
                 jnp.where(lane == 4, sex_acc, 0.0)))))
        out_ref[...] = packed


def multi_label_loss(y, t, *, tile_lanes=None):
    """y: (N, C) = [age_pred, bmi_pred, sex_logits...]; t: (N, 3) = [age, bmi, sex]."""
    y = jnp.asarray(y)
    t = jnp.asarray(t)
    n, c = y.shape
    k = c - 2
    r = c + 3  # rows of the fused slab

    # One fused, transposed input slab: batch on the 128-lane axis, one DMA.
    slab = jnp.concatenate([y.astype(jnp.float32).T,
                            t.astype(jnp.float32).T], axis=0)  # (r, n)

    if tile_lanes is None:
        tile_lanes = max(128, (_TARGET_TILE_BYTES // (r * 4)) // 128 * 128)
    else:
        tile_lanes = max(128, -(-int(tile_lanes) // 128) * 128)

    if n <= tile_lanes:
        tn, n_pad, masked = n, n, False          # whole batch = one block
    else:
        tn = tile_lanes
        n_pad = -(-n // tn) * tn
        masked = n_pad != n
        if masked:
            slab = jnp.pad(slab, ((0, 0), (0, n_pad - n)))
    grid = (n_pad // tn,)

    kernel = functools.partial(_multi_label_loss_kernel,
                               n_valid=n, n_classes=k, tile_n=tn, masked=masked)

    packed = pl.pallas_call(
        kernel,
        out_shape=jax.ShapeDtypeStruct((1, 8), jnp.float32),
        grid=grid,
        in_specs=[pl.BlockSpec((r, tn), lambda i: (0, i))],
        out_specs=pl.BlockSpec((1, 8), lambda i: (0, 0)),
        scratch_shapes=[pltpu.VMEM((1, 1), jnp.float32) for _ in range(6)],
        compiler_params=pltpu.CompilerParams(
            dimension_semantics=("arbitrary",)),  # reduction over N tiles
    )(slab)

    return {'loss': packed[0, 0],
            'age_l1_loss': packed[0, 1],
            'bmi_l1_loss': packed[0, 2],
            'sex_ce_loss': packed[0, 3],
            'sex_acc': packed[0, 4]}


def _reference(y, t):
    """Pure-JAX reference mirroring the PyTorch module."""
    y = y.astype(jnp.float32)
    t = t.astype(jnp.float32)

    def huber(yy, tt, s):
        dif = jnp.abs(tt - yy)
        l2 = 0.5 * dif ** 2 / s
        l1 = (HUBER_DELTA * dif - 0.5 * HUBER_DELTA ** 2) / s
        return jnp.mean(jnp.where(dif < HUBER_DELTA, l2, l1))

    age_l1 = jnp.mean(jnp.abs(y[:, 0] - t[:, 0]))
    bmi_l1 = jnp.mean(jnp.abs(y[:, 1] - t[:, 1]))
    loss_age = huber(y[:, 0], t[:, 0], W_AGE)
    loss_bmi = huber(y[:, 1], t[:, 1], W_BMI)

    logits = y[:, 2:]
    labels = t[:, 2].astype(jnp.int32)
    logz = jax.nn.log_softmax(logits, axis=1)
    sex_ce = -jnp.mean(jnp.take_along_axis(logz, labels[:, None], axis=1))
    sex_acc = jnp.mean((jnp.argmax(logits, axis=1) == labels).astype(jnp.float32))
    loss = (1.0 / 3.0) * (loss_age + loss_bmi + sex_ce / W_SEX)
    return {'loss': loss, 'age_l1_loss': age_l1, 'bmi_l1_loss': bmi_l1,
            'sex_ce_loss': sex_ce, 'sex_acc': sex_acc}


def _make_inputs(key, n, k):
    ks = jax.random.split(key, 6)
    age_pred = 40.0 + 15.0 * jax.random.normal(ks[0], (n, 1), jnp.float32)
    bmi_pred = 25.0 + 4.0 * jax.random.normal(ks[1], (n, 1), jnp.float32)
    sex_logits = jax.random.normal(ks[2], (n, k), jnp.float32)
    y = jnp.concatenate([age_pred, bmi_pred, sex_logits], axis=1)      # (n, k+2)
    age_t = 40.0 + 15.0 * jax.random.normal(ks[3], (n, 1), jnp.float32)
    bmi_t = 25.0 + 4.0 * jax.random.normal(ks[4], (n, 1), jnp.float32)
    sex_t = jax.random.randint(ks[5], (n, 1), 0, k).astype(jnp.float32)
    t = jnp.concatenate([age_t, bmi_t, sex_t], axis=1)                 # (n, 3)
    return y, t


def _check(out, ref):
    for name in out:
        np.testing.assert_allclose(np.asarray(out[name]), np.asarray(ref[name]),
                                   rtol=1e-4, atol=1e-5)


if __name__ == "__main__":
    key = jax.random.PRNGKey(0)
    k1, k2, k3 = jax.random.split(key, 3)

    # 1) Primary small case: batch=8, 2 regression heads + 2 sex classes.
    y, t = _make_inputs(k1, 8, 2)
    out = multi_label_loss(y, t)
    out = jax.tree_util.tree_map(jax.block_until_ready, out)
    _check(out, _reference(y, t))

    # 2) Tiled-grid path (multiple lane tiles + padding mask), still K=2.
    y2, t2 = _make_inputs(k2, 300, 2)
    out2 = multi_label_loss(y2, t2, tile_lanes=128)
    out2 = jax.tree_util.tree_map(jax.block_until_ready, out2)
    _check(out2, _reference(y2, t2))

    # 3) General-K path (3 sex classes), single tile.
    y3, t3 = _make_inputs(k3, 64, 3)
    out3 = multi_label_loss(y3, t3)
    out3 = jax.tree_util.tree_map(jax.block_until_ready, out3)
    _check(out3, _reference(y3, t3))

    print("KERNEL_OK")
</pallas_src>

<mosaic_0001>
module attributes {stable_mosaic.version = 11 : i64} {
  func.func @_multi_label_loss_kernel(%arg0: i32, %arg1: memref<7x8xf32, #tpu.memory_space<vmem>>, %arg2: memref<1x8xf32, #tpu.memory_space<vmem>>, %arg3: memref<1x1xf32, #tpu.memory_space<vmem>>, %arg4: memref<1x1xf32, #tpu.memory_space<vmem>>, %arg5: memref<1x1xf32, #tpu.memory_space<vmem>>, %arg6: memref<1x1xf32, #tpu.memory_space<vmem>>, %arg7: memref<1x1xf32, #tpu.memory_space<vmem>>, %arg8: memref<1x1xf32, #tpu.memory_space<vmem>>) attributes {dimension_semantics = [#tpu.dimension_semantics<arbitrary>], iteration_bounds = array<i64: 1>, scalar_prefetch = 0 : i64, scratch_operands = 6 : i64, tpu.core_type = #tpu.core_type<tc>, window_params = [{transform_indices = @transform_0, window_bounds = array<i64: 7, 8>}, {pipeline_mode = #tpu.pipeline_mode<synchronous>, transform_indices = @transform_1, window_bounds = array<i64: 1, 8>}]} {
    %c0_i32 = arith.constant 0 : i32
    %0 = arith.cmpi eq, %arg0, %c0_i32 : i32
    %1 = arith.extui %0 : i1 to i32
    %c0_i32_0 = arith.constant 0 : i32
    %2 = arith.cmpi ne, %1, %c0_i32_0 : i32
    scf.if %2 {
      %cst_50 = arith.constant 0.000000e+00 : f32
      %86 = vector.broadcast %cst_50 : f32 to vector<1x1xf32>
      %c0_51 = arith.constant 0 : index
      %c0_52 = arith.constant 0 : index
      %87 = vector.load %arg3[%c0_51, %c0_52] : memref<1x1xf32, #tpu.memory_space<vmem>>, vector<1x1xf32>
      tpu.vector_store %arg3[%c0_51, %c0_52], %86 {strides = array<i32>} : memref<1x1xf32, #tpu.memory_space<vmem>>, vector<1x1xf32>,
      %cst_53 = arith.constant 0.000000e+00 : f32
      %88 = vector.broadcast %cst_53 : f32 to vector<1x1xf32>
      %c0_54 = arith.constant 0 : index
      %c0_55 = arith.constant 0 : index
      %89 = vector.load %arg4[%c0_54, %c0_55] : memref<1x1xf32, #tpu.memory_space<vmem>>, vector<1x1xf32>
      tpu.vector_store %arg4[%c0_54, %c0_55], %88 {strides = array<i32>} : memref<1x1xf32, #tpu.memory_space<vmem>>, vector<1x1xf32>,
      %cst_56 = arith.constant 0.000000e+00 : f32
      %90 = vector.broadcast %cst_56 : f32 to vector<1x1xf32>
      %c0_57 = arith.constant 0 : index
      %c0_58 = arith.constant 0 : index
      %91 = vector.load %arg5[%c0_57, %c0_58] : memref<1x1xf32, #tpu.memory_space<vmem>>, vector<1x1xf32>
      tpu.vector_store %arg5[%c0_57, %c0_58], %90 {strides = array<i32>} : memref<1x1xf32, #tpu.memory_space<vmem>>, vector<1x1xf32>,
      %cst_59 = arith.constant 0.000000e+00 : f32
      %92 = vector.broadcast %cst_59 : f32 to vector<1x1xf32>
      %c0_60 = arith.constant 0 : index
      %c0_61 = arith.constant 0 : index
      %93 = vector.load %arg6[%c0_60, %c0_61] : memref<1x1xf32, #tpu.memory_space<vmem>>, vector<1x1xf32>
      tpu.vector_store %arg6[%c0_60, %c0_61], %92 {strides = array<i32>} : memref<1x1xf32, #tpu.memory_space<vmem>>, vector<1x1xf32>,
      %cst_62 = arith.constant 0.000000e+00 : f32
      %94 = vector.broadcast %cst_62 : f32 to vector<1x1xf32>
      %c0_63 = arith.constant 0 : index
      %c0_64 = arith.constant 0 : index
      %95 = vector.load %arg7[%c0_63, %c0_64] : memref<1x1xf32, #tpu.memory_space<vmem>>, vector<1x1xf32>
      tpu.vector_store %arg7[%c0_63, %c0_64], %94 {strides = array<i32>} : memref<1x1xf32, #tpu.memory_space<vmem>>, vector<1x1xf32>,
      %cst_65 = arith.constant 0.000000e+00 : f32
      %96 = vector.broadcast %cst_65 : f32 to vector<1x1xf32>
      %c0_66 = arith.constant 0 : index
      %c0_67 = arith.constant 0 : index
      %97 = vector.load %arg8[%c0_66, %c0_67] : memref<1x1xf32, #tpu.memory_space<vmem>>, vector<1x1xf32>
      tpu.vector_store %arg8[%c0_66, %c0_67], %96 {strides = array<i32>} : memref<1x1xf32, #tpu.memory_space<vmem>>, vector<1x1xf32>,
    } else {
    }
    %c0 = arith.constant 0 : index
    %c0_1 = arith.constant 0 : index
    %3 = vector.load %arg1[%c0, %c0_1] : memref<7x8xf32, #tpu.memory_space<vmem>>, vector<1x8xf32>
    %c1 = arith.constant 1 : index
    %c0_2 = arith.constant 0 : index
    %4 = vector.load %arg1[%c1, %c0_2] : memref<7x8xf32, #tpu.memory_space<vmem>>, vector<1x8xf32>
    %c4 = arith.constant 4 : index
    %c0_3 = arith.constant 0 : index
    %5 = vector.load %arg1[%c4, %c0_3] : memref<7x8xf32, #tpu.memory_space<vmem>>, vector<1x8xf32>
    %c5 = arith.constant 5 : index
    %c0_4 = arith.constant 0 : index
    %6 = vector.load %arg1[%c5, %c0_4] : memref<7x8xf32, #tpu.memory_space<vmem>>, vector<1x8xf32>
    %c6 = arith.constant 6 : index
    %c0_5 = arith.constant 0 : index
    %7 = vector.load %arg1[%c6, %c0_5] : memref<7x8xf32, #tpu.memory_space<vmem>>, vector<1x8xf32>
    %8 = arith.subf %5, %3 : vector<1x8xf32>
    %9 = math.absf %8 : vector<1x8xf32>
    %10 = arith.subf %6, %4 : vector<1x8xf32>
    %11 = math.absf %10 : vector<1x8xf32>
    %12 = arith.mulf %9, %9 : vector<1x8xf32>
    %cst = arith.constant 0.00733891083 : f32
    %13 = vector.broadcast %cst : f32 to vector<1x8xf32>
    %14 = arith.mulf %12, %13 : vector<1x8xf32>
    %cst_6 = arith.constant 0.0733891055 : f32
    %15 = vector.broadcast %cst_6 : f32 to vector<1x8xf32>
    %16 = arith.mulf %9, %15 : vector<1x8xf32>
    %cst_7 = arith.constant 0.183472767 : f32
    %17 = vector.broadcast %cst_7 : f32 to vector<1x8xf32>
    %18 = arith.subf %16, %17 : vector<1x8xf32>
    %cst_8 = arith.constant 5.000000e+00 : f32
    %19 = vector.broadcast %cst_8 : f32 to vector<1x8xf32>
    %20 = arith.cmpf olt, %9, %19 : vector<1x8xf32>
    %21 = arith.select %20, %14, %18 : vector<1x8xi1>, vector<1x8xf32>
    %22 = arith.mulf %11, %11 : vector<1x8xf32>
    %cst_9 = arith.constant 0.02483855 : f32
    %23 = vector.broadcast %cst_9 : f32 to vector<1x8xf32>
    %24 = arith.mulf %22, %23 : vector<1x8xf32>
    %cst_10 = arith.constant 0.248385489 : f32
    %25 = vector.broadcast %cst_10 : f32 to vector<1x8xf32>
    %26 = arith.mulf %11, %25 : vector<1x8xf32>
    %cst_11 = arith.constant 0.620963752 : f32
    %27 = vector.broadcast %cst_11 : f32 to vector<1x8xf32>
    %28 = arith.subf %26, %27 : vector<1x8xf32>
    %cst_12 = arith.constant 5.000000e+00 : f32
    %29 = vector.broadcast %cst_12 : f32 to vector<1x8xf32>
    %30 = arith.cmpf olt, %11, %29 : vector<1x8xf32>
    %31 = arith.select %30, %24, %28 : vector<1x8xi1>, vector<1x8xf32>
    %c2 = arith.constant 2 : index
    %c0_13 = arith.constant 0 : index
    %32 = vector.load %arg1[%c2, %c0_13] : memref<7x8xf32, #tpu.memory_space<vmem>>, vector<1x8xf32>
    %c3 = arith.constant 3 : index
    %c0_14 = arith.constant 0 : index
    %33 = vector.load %arg1[%c3, %c0_14] : memref<7x8xf32, #tpu.memory_space<vmem>>, vector<1x8xf32>
    %34 = arith.subf %33, %32 : vector<1x8xf32>
    %cst_15 = arith.constant 0.000000e+00 : f32
    %35 = vector.broadcast %cst_15 : f32 to vector<1x8xf32>
    %36 = arith.maximumf %34, %35 : vector<1x8xf32>
    %37 = math.absf %34 : vector<1x8xf32>
    %cst_16 = arith.constant 0.000000e+00 : f32
    %38 = vector.broadcast %cst_16 : f32 to vector<1x8xf32>
    %39 = arith.subf %38, %37 : vector<1x8xf32>
    %40 = math.exp %39 : vector<1x8xf32>
    %cst_17 = arith.constant 1.000000e+00 : f32
    %41 = vector.broadcast %cst_17 : f32 to vector<1x8xf32>
    %42 = arith.addf %41, %40 : vector<1x8xf32>
    %43 = math.log %42 : vector<1x8xf32>
    %44 = arith.addf %36, %43 : vector<1x8xf32>
    %45 = arith.mulf %7, %34 : vector<1x8xf32>
    %46 = arith.subf %44, %45 : vector<1x8xf32>
    %47 = arith.cmpf ogt, %33, %32 : vector<1x8xf32>
    %48 = arith.extui %47 : vector<1x8xi1> to vector<1x8xi32>
    %49 = arith.sitofp %48 : vector<1x8xi32> to vector<1x8xf32>
    %50 = arith.cmpf oeq, %49, %7 : vector<1x8xf32>
    %51 = arith.extui %50 : vector<1x8xi1> to vector<1x8xi32>
    %52 = arith.sitofp %51 : vector<1x8xi32> to vector<1x8xf32>
    %c0_18 = arith.constant 0 : index
    %c0_19 = arith.constant 0 : index
    %53 = vector.load %arg6[%c0_18, %c0_19] : memref<1x1xf32, #tpu.memory_space<vmem>>, vector<1x1xf32>
    %cst_20 = arith.constant dense<0.000000e+00> : vector<1xf32>
    %54 = vector.multi_reduction <add>, %9, %cst_20 [1] : vector<1x8xf32> to vector<1xf32>
    %55 = vector.shape_cast %54 : vector<1xf32> to vector<1x1xf32>
    %56 = arith.addf %53, %55 : vector<1x1xf32>
    %c0_21 = arith.constant 0 : index
    %c0_22 = arith.constant 0 : index
    %57 = vector.load %arg6[%c0_21, %c0_22] : memref<1x1xf32, #tpu.memory_space<vmem>>, vector<1x1xf32>
    tpu.vector_store %arg6[%c0_21, %c0_22], %56 {strides = array<i32>} : memref<1x1xf32, #tpu.memory_space<vmem>>, vector<1x1xf32>,
    %c0_23 = arith.constant 0 : index
    %c0_24 = arith.constant 0 : index
    %58 = vector.load %arg7[%c0_23, %c0_24] : memref<1x1xf32, #tpu.memory_space<vmem>>, vector<1x1xf32>
    %cst_25 = arith.constant dense<0.000000e+00> : vector<1xf32>
    %59 = vector.multi_reduction <add>, %11, %cst_25 [1] : vector<1x8xf32> to vector<1xf32>
    %60 = vector.shape_cast %59 : vector<1xf32> to vector<1x1xf32>
    %61 = arith.addf %58, %60 : vector<1x1xf32>
    %c0_26 = arith.constant 0 : index
    %c0_27 = arith.constant 0 : index
    %62 = vector.load %arg7[%c0_26, %c0_27] : memref<1x1xf32, #tpu.memory_space<vmem>>, vector<1x1xf32>
    tpu.vector_store %arg7[%c0_26, %c0_27], %61 {strides = array<i32>} : memref<1x1xf32, #tpu.memory_space<vmem>>, vector<1x1xf32>,
    %c0_28 = arith.constant 0 : index
    %c0_29 = arith.constant 0 : index
    %63 = vector.load %arg3[%c0_28, %c0_29] : memref<1x1xf32, #tpu.memory_space<vmem>>, vector<1x1xf32>
    %cst_30 = arith.constant dense<0.000000e+00> : vector<1xf32>
    %64 = vector.multi_reduction <add>, %21, %cst_30 [1] : vector<1x8xf32> to vector<1xf32>
    %65 = vector.shape_cast %64 : vector<1xf32> to vector<1x1xf32>
    %66 = arith.addf %63, %65 : vector<1x1xf32>
    %c0_31 = arith.constant 0 : index
    %c0_32 = arith.constant 0 : index
    %67 = vector.load %arg3[%c0_31, %c0_32] : memref<1x1xf32, #tpu.memory_space<vmem>>, vector<1x1xf32>
    tpu.vector_store %arg3[%c0_31, %c0_32], %66 {strides = array<i32>} : memref<1x1xf32, #tpu.memory_space<vmem>>, vector<1x1xf32>,
    %c0_33 = arith.constant 0 : index
    %c0_34 = arith.constant 0 : index
    %68 = vector.load %arg4[%c0_33, %c0_34] : memref<1x1xf32, #tpu.memory_space<vmem>>, vector<1x1xf32>
    %cst_35 = arith.constant dense<0.000000e+00> : vector<1xf32>
    %69 = vector.multi_reduction <add>, %31, %cst_35 [1] : vector<1x8xf32> to vector<1xf32>
    %70 = vector.shape_cast %69 : vector<1xf32> to vector<1x1xf32>
    %71 = arith.addf %68, %70 : vector<1x1xf32>
    %c0_36 = arith.constant 0 : index
    %c0_37 = arith.constant 0 : index
    %72 = vector.load %arg4[%c0_36, %c0_37] : memref<1x1xf32, #tpu.memory_space<vmem>>, vector<1x1xf32>
    tpu.vector_store %arg4[%c0_36, %c0_37], %71 {strides = array<i32>} : memref<1x1xf32, #tpu.memory_space<vmem>>, vector<1x1xf32>,
    %c0_38 = arith.constant 0 : index
    %c0_39 = arith.constant 0 : index
    %73 = vector.load %arg5[%c0_38, %c0_39] : memref<1x1xf32, #tpu.memory_space<vmem>>, vector<1x1xf32>
    %cst_40 = arith.constant dense<0.000000e+00> : vector<1xf32>
    %74 = vector.multi_reduction <add>, %46, %cst_40 [1] : vector<1x8xf32> to vector<1xf32>
    %75 = vector.shape_cast %74 : vector<1xf32> to vector<1x1xf32>
    %76 = arith.addf %73, %75 : vector<1x1xf32>
    %c0_41 = arith.constant 0 : index
    %c0_42 = arith.constant 0 : index
    %77 = vector.load %arg5[%c0_41, %c0_42] : memref<1x1xf32, #tpu.memory_space<vmem>>, vector<1x1xf32>
    tpu.vector_store %arg5[%c0_41, %c0_42], %76 {strides = array<i32>} : memref<1x1xf32, #tpu.memory_space<vmem>>, vector<1x1xf32>,
    %c0_43 = arith.constant 0 : index
    %c0_44 = arith.constant 0 : index
    %78 = vector.load %arg8[%c0_43, %c0_44] : memref<1x1xf32, #tpu.memory_space<vmem>>, vector<1x1xf32>
    %cst_45 = arith.constant dense<0.000000e+00> : vector<1xf32>
    %79 = vector.multi_reduction <add>, %52, %cst_45 [1] : vector<1x8xf32> to vector<1xf32>
    %80 = vector.shape_cast %79 : vector<1xf32> to vector<1x1xf32>
    %81 = arith.addf %78, %80 : vector<1x1xf32>
    %c0_46 = arith.constant 0 : index
    %c0_47 = arith.constant 0 : index
    %82 = vector.load %arg8[%c0_46, %c0_47] : memref<1x1xf32, #tpu.memory_space<vmem>>, vector<1x1xf32>
    tpu.vector_store %arg8[%c0_46, %c0_47], %81 {strides = array<i32>} : memref<1x1xf32, #tpu.memory_space<vmem>>, vector<1x1xf32>,
    %c0_i32_48 = arith.constant 0 : i32
    %83 = arith.cmpi eq, %arg0, %c0_i32_48 : i32
    %84 = arith.extui %83 : i1 to i32
    %c0_i32_49 = arith.constant 0 : i32
    %85 = arith.cmpi ne, %84, %c0_i32_49 : i32
    scf.if %85 {
      %c0_50 = arith.constant 0 : index
      %c0_51 = arith.constant 0 : index
      %86 = vector.load %arg6[%c0_50, %c0_51] : memref<1x1xf32, #tpu.memory_space<vmem>>, vector<1x1xf32>
      %cst_52 = arith.constant 1.250000e-01 : f32
      %87 = vector.broadcast %cst_52 : f32 to vector<1x1xf32>
      %88 = arith.mulf %86, %87 : vector<1x1xf32>
      %c0_53 = arith.constant 0 : index
      %c0_54 = arith.constant 0 : index
      %89 = vector.load %arg7[%c0_53, %c0_54] : memref<1x1xf32, #tpu.memory_space<vmem>>, vector<1x1xf32>
      %cst_55 = arith.constant 1.250000e-01 : f32
      %90 = vector.broadcast %cst_55 : f32 to vector<1x1xf32>
      %91 = arith.mulf %89, %90 : vector<1x1xf32>
      %c0_56 = arith.constant 0 : index
      %c0_57 = arith.constant 0 : index
      %92 = vector.load %arg3[%c0_56, %c0_57] : memref<1x1xf32, #tpu.memory_space<vmem>>, vector<1x1xf32>
      %cst_58 = arith.constant 1.250000e-01 : f32
      %93 = vector.broadcast %cst_58 : f32 to vector<1x1xf32>
      %94 = arith.mulf %92, %93 : vector<1x1xf32>
      %c0_59 = arith.constant 0 : index
      %c0_60 = arith.constant 0 : index
      %95 = vector.load %arg4[%c0_59, %c0_60] : memref<1x1xf32, #tpu.memory_space<vmem>>, vector<1x1xf32>
      %cst_61 = arith.constant 1.250000e-01 : f32
      %96 = vector.broadcast %cst_61 : f32 to vector<1x1xf32>
      %97 = arith.mulf %95, %96 : vector<1x1xf32>
      %c0_62 = arith.constant 0 : index
      %c0_63 = arith.constant 0 : index
      %98 = vector.load %arg5[%c0_62, %c0_63] : memref<1x1xf32, #tpu.memory_space<vmem>>, vector<1x1xf32>
      %cst_64 = arith.constant 1.250000e-01 : f32
      %99 = vector.broadcast %cst_64 : f32 to vector<1x1xf32>
      %100 = arith.mulf %98, %99 : vector<1x1xf32>
      %c0_65 = arith.constant 0 : index
      %c0_66 = arith.constant 0 : index
      %101 = vector.load %arg8[%c0_65, %c0_66] : memref<1x1xf32, #tpu.memory_space<vmem>>, vector<1x1xf32>
      %cst_67 = arith.constant 1.250000e-01 : f32
      %102 = vector.broadcast %cst_67 : f32 to vector<1x1xf32>
      %103 = arith.mulf %101, %102 : vector<1x1xf32>
      %104 = arith.addf %94, %97 : vector<1x1xf32>
      %cst_68 = arith.constant 1.61290324 : f32
      %105 = vector.broadcast %cst_68 : f32 to vector<1x1xf32>
      %106 = arith.mulf %100, %105 : vector<1x1xf32>
      %107 = arith.addf %104, %106 : vector<1x1xf32>
      %cst_69 = arith.constant 0.333333343 : f32
      %108 = vector.broadcast %cst_69 : f32 to vector<1x1xf32>
      %109 = arith.mulf %107, %108 : vector<1x1xf32>
      %110 = tpu.iota {dimensions = array<i32: 1>} : vector<1x8xi32>
      %c0_i32_70 = arith.constant 0 : i32
      %111 = vector.broadcast %c0_i32_70 : i32 to vector<1x8xi32>
      %112 = arith.cmpi eq, %110, %111 : vector<1x8xi32>
      %c1_i32 = arith.constant 1 : i32
      %113 = vector.broadcast %c1_i32 : i32 to vector<1x8xi32>
      %114 = arith.cmpi eq, %110, %113 : vector<1x8xi32>
      %c2_i32 = arith.constant 2 : i32
      %115 = vector.broadcast %c2_i32 : i32 to vector<1x8xi32>
      %116 = arith.cmpi eq, %110, %115 : vector<1x8xi32>
      %c3_i32 = arith.constant 3 : i32
      %117 = vector.broadcast %c3_i32 : i32 to vector<1x8xi32>
      %118 = arith.cmpi eq, %110, %117 : vector<1x8xi32>
      %c4_i32 = arith.constant 4 : i32
      %119 = vector.broadcast %c4_i32 : i32 to vector<1x8xi32>
      %120 = arith.cmpi eq, %110, %119 : vector<1x8xi32>
      %cst_71 = arith.constant 0.000000e+00 : f32
      %121 = vector.shape_cast %103 : vector<1x1xf32> to vector<1x1xf32>
      %122 = vector.broadcast %121 : vector<1x1xf32> to vector<1x8xf32>
      %123 = vector.broadcast %cst_71 : f32 to vector<1x8xf32>
      %124 = arith.select %120, %122, %123 : vector<1x8xi1>, vector<1x8xf32>
      %125 = vector.shape_cast %100 : vector<1x1xf32> to vector<1x1xf32>
      %126 = vector.broadcast %125 : vector<1x1xf32> to vector<1x8xf32>
      %127 = arith.select %118, %126, %124 : vector<1x8xi1>, vector<1x8xf32>
      %128 = vector.shape_cast %91 : vector<1x1xf32> to vector<1x1xf32>
      %129 = vector.broadcast %128 : vector<1x1xf32> to vector<1x8xf32>
      %130 = arith.select %116, %129, %127 : vector<1x8xi1>, vector<1x8xf32>
      %131 = vector.shape_cast %88 : vector<1x1xf32> to vector<1x1xf32>
      %132 = vector.broadcast %131 : vector<1x1xf32> to vector<1x8xf32>
      %133 = arith.select %114, %132, %130 : vector<1x8xi1>, vector<1x8xf32>
      %134 = vector.shape_cast %109 : vector<1x1xf32> to vector<1x1xf32>
      %135 = vector.broadcast %134 : vector<1x1xf32> to vector<1x8xf32>
      %136 = arith.select %112, %135, %133 : vector<1x8xi1>, vector<1x8xf32>
      %c0_72 = arith.constant 0 : index
      %c0_73 = arith.constant 0 : index
      %137 = vector.load %arg2[%c0_72, %c0_73] : memref<1x8xf32, #tpu.memory_space<vmem>>, vector<1x8xf32>
      tpu.vector_store %arg2[%c0_72, %c0_73], %136 {strides = array<i32>} : memref<1x8xf32, #tpu.memory_space<vmem>>, vector<1x8xf32>,
    } else {
    }
    return
  }
  func.func @transform_0(%arg0: i32) -> (i32, i32) {
    %c0_i32 = arith.constant 0 : i32
    %c0_i32_0 = arith.constant 0 : i32
    return %c0_i32, %arg0 : i32, i32
  }
  func.func @transform_1(%arg0: i32) -> (i32, i32) {
    %c0_i32 = arith.constant 0 : i32
    %c0_i32_0 = arith.constant 0 : i32
    %c0_i32_1 = arith.constant 0 : i32
    return %c0_i32, %c0_i32_0 : i32, i32
  }
}

</mosaic_0001>

<bundles_post_ra>
// kernel: tpu_custom_call.1
= control target key start
LH: loop header
LB: loop body
LE: loop exit
PB: predicated region body
PF: predicated region fallthrough
CT: control target
= control target key end

     0   :  { %6 = vsyncpa [#allocation9], 0  ;;  %s322_s0 = inlined_call_operand.hbm [shape: f32[7,8], index: 0, kind: input, shape index: {}]   ;;  %s323_s1 = inlined_call_operand.hbm [shape: f32[1,8], index: 1, kind: output, shape index: {}]  }
   0x1   :  { %7 = vsyncpa [#allocation10], 0  ;;  %s265_s6 = smov [#allocation8]   ;;  %s217_s10 = scalar_lea.hbm %s322_s0, 128 }
   0x2   :  { %s14_s7 = sshll.u32 %s265_s6, 4  ;;  %p218_p0 = scmp.ne.s32.totalorder %s322_s0, %s217_s10  ;;  %s15_s7 = int_to_ptr.vmem [resolvable:$true] %s14_s7 }
   0x3   :  { %p221_p1 = scmp.lt.u32.totalorder %s217_s10, %s322_s0 }
   0x5   :  { %p223_p2 = pnand %p221_p1, %p218_p0 }
   0x7   :  { %226 = shalt.err (!%p223_p2)
}
   0x8   :  { %s227_s15 = scalar_lea.vmem %s15_s7, 128  ;;  %p232_p4 = scmp.lt.s32.totalorder %s15_s7, %s15_s7 }
   0x9   :  { %p228_p3 = scmp.ne.s32.totalorder %s15_s7, %s227_s15  ;;  %p233_p5 = scmp.lt.s32.totalorder %s227_s15, %s227_s15 }
   0xb   :  { %p234_p6 = por %p233_p5, %p232_p4 }
   0xd   :  { %p235_p7 = pnand %p234_p6, %p228_p3 }
   0xf   :  { %238 = shalt.err (!%p235_p7)
}
  0x10   :  { %17 = dma.hbm_to_vmem [thread:$0]  %s322_s0, 128, %s15_s7, [#allocation9]  }
  0x11   :  { %261 = dma.done.wait [#allocation9], 128  }
  0x12   :  { %262 = vsyncadd [#allocation9], 4294967168  ;;  %vm25_vm0 = vcmask 0   ;;  %v266_v0 = vmov 0.0   ;;  %v32_v1 = vld [vmem:[#allocation8] sm:$0x1] }
  0x13   :  { %26 = vst.msk [vmem:[#allocation2] sm:$0x1] %vm25_vm0, %v266_v0  ;;  %27 = vst.msk [vmem:[#allocation3] sm:$0x1] %vm25_vm0, %v266_v0  ;;  %v34_v2 = vld [vmem:[#allocation8 + $0x4] sm:$0x1] }
  0x14   :  { %28 = vst.msk [vmem:[#allocation4] sm:$0x1] %vm25_vm0, %v266_v0  ;;  %29 = vst.msk [vmem:[#allocation5] sm:$0x1] %vm25_vm0, %v266_v0  ;;  %v33_v3 = vld [vmem:[#allocation8 + $0x1] sm:$0x1]  ;;  %v37_v4 = vsub.f32 %v34_v2, %v32_v1 }
  0x15   :  { %30 = vst.msk [vmem:[#allocation6] sm:$0x1] %vm25_vm0, %v266_v0  ;;  %31 = vst.msk [vmem:[#allocation7] sm:$0x1] %vm25_vm0, %v266_v0  ;;  %v35_v5 = vld [vmem:[#allocation8 + $0x5] sm:$0x1] }
  0x16   :  { %v53_v6 = vld [vmem:[#allocation8 + $0x2] sm:$0x1]  ;;  %v39_v7 = vsub.f32 %v35_v5, %v33_v3  ;;  %v54_v8 = vld [vmem:[#allocation8 + $0x3] sm:$0x1]  ;;  %v38_v9 = vand.u32 2147483647, %v37_v4 }
  0x17   :  { %v55_v10 = vsub.f32 %v54_v8, %v53_v6  ;;  %vm74_vm2 = vcmask 57344   ;;  %vm67_vm4 = vcmp.gt.f32.partialorder %v54_v8, %v53_v6  ;;  %v36_v30 = vld [vmem:[#allocation8 + $0x6] sm:$0x1]  ;;  %v267_v42 = vmov 0   ;;  %s268_s0 = smov [#allocation11]  }
  0x18   :  { %v40_v11 = vand.u32 2147483647, %v39_v7  ;;  %v41_v12 = vmul.f32 %v38_v9, %v38_v9  ;;  %v43_v13 = vmul.f32 0.073389105, %v38_v9  ;;  %vm45_vm1 = vcmp.lt.f32.partialorder %v38_v9, 5.0  ;;  %212 = vset.pattern.permute.xlu1 %v267_v42  ;;  %211 = vset.pattern.permute.xlu0 %v267_v42  ;;  %s194_s18 = sshll.u32 %s268_s0, 4  ;;  %s195_s18 = int_to_ptr.vmem [resolvable:$true] %s194_s18 }
  0x19   :  { %v57_v16 = vand.u32 2147483647, %v55_v10  ;;  %v56_v31 = vmax.f32 %v55_v10, 0.0  ;;  %v205_v33 = vsel %vm67_vm4, 1.0, %v266_v0  ;;  %v65_v35 = vmul.f32 %v55_v10, %v36_v30  ;;  %s239_s19 = scalar_lea.vmem %s195_s18, 16  ;;  %s243_s20 = scalar_lea.vmem %s195_s18, 32 }
  0x1a   :  { %v47_v14 = vmul.f32 %v40_v11, %v40_v11  ;;  %v49_v15 = vmul.f32 0.24838549, %v40_v11  ;;  %v42_v17 = vmul.f32 0.007338911, %v41_v12  ;;  %v203_v18 = vadd.f32 -0.18347277, %v43_v13  ;;  %p240_p8 = scmp.ne.s32.totalorder %s195_s18, %s239_s19  ;;  %p244_p9 = scmp.lt.s32.totalorder %s195_s18, %s195_s18 }
  0x1b   :  { %vm51_vm3 = vcmp.lt.f32.partialorder %v40_v11, 5.0  ;;  %v58_v21 = vsub.f32 0.0, %v57_v16  ;;  %v82_v27 = vsel %vm74_vm2, %v40_v11, 0.0  ;;  %vm70_vm5 = vcmp.eq.f32.partialorder %v205_v33, %v36_v30  ;;  %v87_v43 = vld [vmem:[#allocation2] sm:$0x1]  ;;  %p245_p10 = scmp.lt.s32.totalorder %s243_s20, %s239_s19 }
  0x1c   :  { %v48_v19 = vmul.f32 0.02483855, %v47_v14  ;;  %v204_v20 = vadd.f32 -0.62096375, %v49_v15  ;;  %v46_v22 = vsel %vm45_vm1, %v42_v17, %v203_v18  ;;  %v206_v38 = vsel %vm70_vm5, 1.0, %v266_v0 }
  0x1d   :  { %v88_v23 = vsel %vm74_vm2, %v46_v22, 0.0  ;;  %v59_v25 = vmul.f32 1.442695, %v58_v21  ;;  %v106_v40 = vsel %vm74_vm2, %v206_v38, 0.0  ;;  %v75_v41 = vsel %vm74_vm2, %v38_v9, 0.0  ;;  %p246_p11 = por %p245_p10, %p244_p9 }
  0x1e   :  { %v52_v24 = vsel %vm51_vm3, %v48_v19, %v204_v20  ;;  %89 = vadd.xlane.f32.xlu0 %v88_v23  ;;  %v93_v46 = vld [vmem:[#allocation3] sm:$0x1]  ;;  %v81_v49 = vld [vmem:[#allocation6] sm:$0x1]  ;;  %v99_v54 = vld [vmem:[#allocation4] sm:$0x1]  ;;  %v130_v13 = vlaneseq }
  0x1f   :  { %v94_v26 = vsel %vm74_vm2, %v52_v24, 0.0  ;;  %213 = vpow2.f32 %v59_v25  ;;  %v105_v57 = vld [vmem:[#allocation7] sm:$0x1]  ;;  %v73_v60 = vld [vmem:[#allocation5] sm:$0x1]  ;;  %p247_p12 = pnand %p246_p11, %p240_p8 }
  0x20   :  { %v143_v14 = vshrl.u32 %v130_v13, 7  ;;  %v131_v17 = vand.u32 127, %v130_v13 }
  0x22   :  { %95 = vadd.xlane.f32.xlu0 %v94_v26  ;;  %v144_v16 = vsub.s32 0, %v143_v14  ;;  %vm136_vm6 = vcmp.eq.s32.totalorder %v131_v17, 4  ;;  %vm135_vm7 = vcmp.eq.s32.totalorder %v131_v17, 3  ;;  %vm134_vm8 = vcmp.eq.s32.totalorder %v131_v17, 2 }
  0x23   :  { %vm133_vm9 = vcmp.eq.s32.totalorder %v131_v17, 1  ;;  %vm132_vm10 = vcmp.eq.s32.totalorder %v131_v17, 0 }
  0x26   :  { %83 = vadd.xlane.f32.xlu0 %v82_v27 }
  0x29   :  { %v214_v28 = vpop.eup %213 }
  0x2a   :  { %v61_v29 = vadd.f32 1.0, %v214_v28 }
  0x2c   :  { %215 = vlog2.f32 %v61_v29 }
  0x36   :  { %v216_v32 = vpop.eup %215 }
  0x37   :  { %v63_v34 = vmul.f32 0.6931472, %v216_v32 }
  0x39   :  { %v64_v36 = vadd.f32 %v63_v34, %v56_v31 }
  0x3b   :  { %v66_v37 = vsub.f32 %v64_v36, %v65_v35 }
  0x3d   :  { %v100_v39 = vsel %vm74_vm2, %v66_v37, 0.0 }
  0x3e   :  { %101 = vadd.xlane.f32.xlu1 %v100_v39 }
  0x42   :  { %107 = vadd.xlane.f32.xlu1 %v106_v40 }
  0x46   :  { %76 = vadd.xlane.f32.xlu1 %v75_v41 }
  0xab   :  { %v90_v44 = vpop.xlane.xlu0 %89 }
  0xac   :  { %v91_v45 = vadd.f32 %v90_v44, %v87_v43 }
  0xae   :  { %92 = vst.msk [vmem:[#allocation2] sm:$0x1] %vm25_vm0, %v91_v45 }
  0xaf   :  { %v96_v47 = vpop.xlane.xlu0 %95 }
  0xb0   :  { %v97_v48 = vadd.f32 %v96_v47, %v93_v46 }
  0xb2   :  { %98 = vst.msk [vmem:[#allocation3] sm:$0x1] %vm25_vm0, %v97_v48 }
  0xb3   :  { %v84_v50 = vpop.xlane.xlu0 %83 }
  0xb4   :  { %v85_v51 = vadd.f32 %v84_v50, %v81_v49 }
  0xb5   :  { %v118_v1 = vld [vmem:[#allocation2] sm:$0x1] }
  0xb6   :  { %86 = vst.msk [vmem:[#allocation6] sm:$0x1] %vm25_vm0, %v85_v51  ;;  %v119_v5 = vmul.f32 0.125, %v118_v1 }
  0xb9   :  { %v120_v2 = vld [vmem:[#allocation3] sm:$0x1] }
  0xba   :  { %v121_v6 = vmul.f32 0.125, %v120_v2 }
  0xbc   :  { %v126_v10 = vadd.f32 %v121_v6, %v119_v5 }
  0xbd   :  { %v116_v52 = vld [vmem:[#allocation6] sm:$0x1] }
  0xbe   :  { %v117_v53 = vmul.f32 0.125, %v116_v52 }
  0xc0   :  { %159 = vperm.xlu1 %212, %v117_v53  }
  0xcb   :  { %v102_v55 = vpop.xlane.xlu1 %101 }
  0xcc   :  { %v103_v56 = vadd.f32 %v102_v55, %v99_v54 }
  0xce   :  { %104 = vst.msk [vmem:[#allocation4] sm:$0x1] %vm25_vm0, %v103_v56 }
  0xcf   :  { %v108_v58 = vpop.xlane.xlu1 %107 }
  0xd0   :  { %v109_v59 = vadd.f32 %v108_v58, %v105_v57 }
  0xd2   :  { %110 = vst.msk [vmem:[#allocation7] sm:$0x1] %vm25_vm0, %v109_v59 }
  0xd3   :  { %v77_v61 = vpop.xlane.xlu1 %76 }
  0xd4   :  { %v78_v62 = vadd.f32 %v77_v61, %v73_v60 }
  0xd5   :  { %v122_v63 = vld [vmem:[#allocation4] sm:$0x1] }
  0xd6   :  { %80 = vst.msk [vmem:[#allocation5] sm:$0x1] %vm25_vm0, %v78_v62  ;;  %v123_v4 = vmul.f32 0.125, %v122_v63 }
  0xd8   :  { %v127_v9 = vmul.f32 1.6129032, %v123_v4 }
  0xd9   :  { %v124_v0 = vld [vmem:[#allocation7] sm:$0x1] }
  0xda   :  { %v125_v3 = vmul.f32 0.125, %v124_v0  ;;  %v128_v11 = vadd.f32 %v127_v9, %v126_v10 }
  0xdc   :  { %139 = vperm.xlu0 %211, %v125_v3   ;;  %v129_v12 = vmul.f32 0.33333334, %v128_v11 }
  0xdd   :  { %v114_v7 = vld [vmem:[#allocation5] sm:$0x1] }
  0xde   :  { %v115_v8 = vmul.f32 0.125, %v114_v7 }
  0xe0   :  { %169 = vperm.xlu1 %212, %v115_v8  }
  0xe4   :  { %149 = vperm.xlu1 %212, %v123_v4  }
  0xe8   :  { %179 = vperm.xlu1 %212, %v129_v12  }
 0x13f   :  { %v160_v15 = vpop.permute.xlu1 %159 }
 0x140   :  { %v165_v24 = vrot.slane %v160_v15, %v144_v16 }
 0x15b   :  { %v140_v18 = vpop.permute.xlu0 %139 }
 0x15c   :  { %v145_v20 = vrot.slane %v140_v18, %v144_v16 }
 0x15e   :  { %v146_v23 = vsel %vm136_vm6, %v145_v20, 0.0 }
 0x15f   :  { %v170_v19 = vpop.permute.xlu1 %169 }
 0x160   :  { %v175_v25 = vrot.slane %v170_v19, %v144_v16 }
 0x163   :  { %v150_v21 = vpop.permute.xlu1 %149 }
 0x164   :  { %v155_v22 = vrot.slane %v150_v21, %v144_v16 }
 0x166   :  { %v156_v26 = vsel %vm135_vm7, %v155_v22, %v146_v23 }
 0x167   :  { %v166_v27 = vsel %vm134_vm8, %v165_v24, %v156_v26  ;;  %v180_v28 = vpop.permute.xlu1 %179 }
 0x168   :  { %v185_v29 = vrot.slane %v180_v28, %v144_v16  ;;  %v176_v30 = vsel %vm133_vm9, %v175_v25, %v166_v27 }
 0x16a   :  { %v186_v31 = vsel %vm132_vm10, %v185_v29, %v176_v30 }
 0x16b   :  { %187 = vst.msk [vmem:[#allocation11] sm:$0x1] %vm74_vm2, %v186_v31 }
 0x16c   :  { %250 = shalt.err (!%p247_p12)
}
 0x16d   :  { %s251_s23 = scalar_lea.hbm %s323_s1, 16 }
 0x16e   :  { %p252_p13 = scmp.ne.s32.totalorder %s323_s1, %s251_s23  ;;  %p255_p0 = scmp.lt.u32.totalorder %s251_s23, %s323_s1 }
 0x170   :  { %p257_p1 = pnand %p255_p0, %p252_p13 }
 0x172   :  { %260 = shalt.err (!%p257_p1)
}
 0x173   :  { %197 = dma.vmem_to_hbm [thread:$0]  %s195_s18, 16, %s323_s1, [#allocation10]  }
 0x174   :  { %263 = dma.done.wait [#allocation10], 16  }
 0x175   :  { %264 = vsyncadd [#allocation10], 4294967280 }
 0x176   :  { %201 = vsyncpa [#allocation9], 1 }
 0x177   :  { %202 = vsyncpa [#allocation10], 1 }

</bundles_post_ra>
